<compile_context>
chip_gen: v5e
topology: v5e:2x2
jax: 0.10.0
libtpu: 0.0.40
codegen_flags: <defaults>
</compile_context>

<pallas_src>
import functools

import jax
import jax.numpy as jnp
from jax import lax
from jax.experimental import pallas as pl
from jax.experimental.pallas import tpu as pltpu


_NEG_INF = -1e30  # bias value for padded label columns (masks softmax)

# Single-buffer the VMEM-resident operands (constant index_map => fetched once;
# double-buffering them only wastes VMEM).
_RESIDENT_KW = dict(pipeline_mode=pl.Buffered(1)) if hasattr(pl, "Buffered") else {}


def _round_up(x, m):
    return pl.cdiv(x, m) * m


def _vmem_budget_bytes():
    """Generation-aware VMEM budget: ~115 MiB on v5e/v6e (128 MiB physical),
    ~56 MiB on v7x (64 MiB physical); conservative 56 MiB if query fails."""
    try:
        cap = int(pltpu.get_tpu_info().vmem_capacity_bytes)
    except Exception:  # no TPU info available -> safe default for any gen
        cap = 64 * 1024 * 1024
    return int(max(min(cap - (8 << 20), int(cap * 0.90)), 16 << 20))


def _auto_block_b(batch, n, d, l_pad, x_itemsize, logits_itemsize, vmem_budget):
    """Largest lane/sublane-friendly batch tile that fits the VMEM budget.

    Corrected footprint arithmetic (per review):
      resident x1 : weight [n, L_pad, D] bf16 + bias [1, L_pad] f32 (Buffered(1))
      streamed x2 : feature tile, logits tile, target, nll (double-buffered)
      scratch  x1 : f32 accumulator [block_b, L_pad]
    """
    resident = n * l_pad * d * 2 + l_pad * 4
    per_row = (2 * n * d * x_itemsize          # feature tile (x2 buffers)
               + 2 * l_pad * logits_itemsize   # logits tile  (x2 buffers)
               + l_pad * 4                     # f32 accumulator scratch (x1)
               + 2 * (4 + 4))                  # target + per-row nll (x2)
    avail = max(vmem_budget - resident - (4 << 20), per_row * 128)
    bb = min(avail // per_row, 2048)
    if batch >= 512:
        # Keep >= 2 tiles so both v7x TensorCores get work on the parallel axis.
        bb = min(bb, _round_up(pl.cdiv(batch, 2), 128))
    return int(max((bb // 128) * 128, 128))


def _accumulate_logits(x_ref, w_ref, acc_ref):
    """acc[TB, L_pad] (f32 VMEM scratch) = sum_j cls_j @ W_j^T.

    The CLS concat over the n backbone blocks is realized as n accumulating
    MXU matmuls into one f32 accumulator (v7x MRB-friendly acc+=)."""
    n = x_ref.shape[0]
    for j in range(n):
        xj = x_ref[j].astype(jnp.bfloat16)              # [TB, D]
        pj = lax.dot_general(
            xj, w_ref[j],
            dimension_numbers=(((1,), (1,)), ((), ())),
            preferred_element_type=jnp.float32)          # [TB, L_pad] f32
        if j == 0:
            acc_ref[...] = pj
        else:
            acc_ref[...] += pj


def _infer_kernel(x_ref, w_ref, b_ref, logits_ref, acc_ref):
    _accumulate_logits(x_ref, w_ref, acc_ref)
    logits_ref[...] = (acc_ref[...] + b_ref[...]).astype(logits_ref.dtype)


def _train_kernel(x_ref, w_ref, b_ref, tgt_ref, logits_ref, nll_ref, acc_ref):
    _accumulate_logits(x_ref, w_ref, acc_ref)
    logits = acc_ref[...] + b_ref[...]                   # [TB, L_pad] f32
    logits_ref[...] = logits.astype(logits_ref.dtype)
    # Numerically-stable per-row cross entropy in f32 (independent of the
    # logits output dtype).  Padded label columns carry a -1e30 bias, so they
    # contribute 0 to the softmax denominator.
    m = jnp.max(logits, axis=-1, keepdims=True)          # [TB, 1]
    lse = jnp.log(jnp.sum(jnp.exp(logits - m), axis=-1, keepdims=True)) + m
    tgt = tgt_ref[...]                                   # [TB, 1] int32
    label_ids = lax.broadcasted_iota(jnp.int32, logits.shape, 1)
    picked = jnp.sum(jnp.where(label_ids == tgt, logits, 0.0),
                     axis=-1, keepdims=True)             # [TB, 1]
    nll_ref[...] = lse - picked


@functools.partial(jax.jit,
                   static_argnames=("block_b", "vmem_limit", "logits_dtype"))
def _linear_head(feats, w_nld, bias_p, tgt, *, block_b, vmem_limit, logits_dtype):
    """feats: [n, B_pad, R] (R >= D; CLS token lives in lanes [0, D));
    w_nld: [n, L_pad, D] bf16; bias_p: [1, L_pad] f32; tgt: [B_pad, 1] or None.
    Requires B_pad % block_b == 0 (the wrapper guarantees it)."""
    n, batch_p, _ = feats.shape
    _, l_pad, d = w_nld.shape
    num_tiles = batch_p // block_b

    x_spec = pl.BlockSpec((n, block_b, d), lambda i: (0, i, 0))      # streamed
    w_spec = pl.BlockSpec((n, l_pad, d), lambda i: (0, 0, 0), **_RESIDENT_KW)
    b_spec = pl.BlockSpec((1, l_pad), lambda i: (0, 0), **_RESIDENT_KW)
    logits_spec = pl.BlockSpec((block_b, l_pad), lambda i: (i, 0))
    scratch = [pltpu.VMEM((block_b, l_pad), jnp.float32)]            # f32 acc

    cparams = pltpu.CompilerParams(
        # "parallel": shard batch tiles across v7x's 2 TensorCores.
        # TODO(synk): switch to pltpu.CORE_PARALLEL / core_map if plain
        # "parallel" is measured not to split the 1-D grid across TCs.
        dimension_semantics=("parallel",),
        vmem_limit_bytes=int(vmem_limit))

    if tgt is None:
        logits = pl.pallas_call(
            _infer_kernel,
            grid=(num_tiles,),
            in_specs=[x_spec, w_spec, b_spec],
            out_specs=logits_spec,
            out_shape=jax.ShapeDtypeStruct((batch_p, l_pad), logits_dtype),
            scratch_shapes=scratch,
            compiler_params=cparams,
        )(feats, w_nld, bias_p)
        return logits, None

    tgt_spec = pl.BlockSpec((block_b, 1), lambda i: (i, 0))
    # Per-row NLL kept as a tiny f32 column (<0.1% of the feature traffic);
    # lane-dense reformulations were rejected to stay within the (8,128)
    # block-shape constraints for arbitrary tile counts.
    nll_spec = pl.BlockSpec((block_b, 1), lambda i: (i, 0))
    logits, nll = pl.pallas_call(
        _train_kernel,
        grid=(num_tiles,),
        in_specs=[x_spec, w_spec, b_spec, tgt_spec],
        out_specs=(logits_spec, nll_spec),
        out_shape=(jax.ShapeDtypeStruct((batch_p, l_pad), logits_dtype),
                   jax.ShapeDtypeStruct((batch_p, 1), jnp.float32)),
        scratch_shapes=scratch,
        compiler_params=cparams,
    )(feats, w_nld, bias_p, tgt)
    return logits, nll


def prepare_classifier_params(weight, bias, n, embed_dim):
    """One-time param prep (in training, do this once, NOT per step): pad the
    label dim to a lane-dense multiple of 128, split the weight per backbone
    block ([n, L_pad, D]) and cast the matmul operand to bf16."""
    num_labels, feat_dim = weight.shape
    assert feat_dim == n * embed_dim
    l_pad = _round_up(num_labels, 128)
    w = jnp.pad(weight.astype(jnp.float32), ((0, l_pad - num_labels), (0, 0)))
    w_nld = jnp.transpose(w.reshape(l_pad, n, embed_dim), (1, 0, 2))
    w_nld = w_nld.astype(jnp.bfloat16)                        # [n, L_pad, D]
    bias_p = jnp.concatenate(
        [bias.astype(jnp.float32),
         jnp.full((l_pad - num_labels,), _NEG_INF, jnp.float32)],
    ).reshape(1, l_pad)                                       # [1, L_pad]
    return w_nld, bias_p


def vit_linear_forward(intermediate_outputs, weight, bias, target=None,
                       block_b=None, logits_dtype=jnp.bfloat16):
    """Mirror VitLinear.forward on precomputed frozen-backbone features.

    intermediate_outputs: [n, B, S, D] (torch: n tensors [B, S, D] from
      get_intermediate_layers).  Prefer bf16 features.
      TODO(synk): if the frozen backbone emits f32, cast/store bf16 upstream —
      feature streaming dominates and f32 doubles the HBM bytes; the in-kernel
      cast cannot recover them.
    weight: [num_labels, n*D] (torch nn.Linear layout), bias: [num_labels].
    target: optional int [B].
    Returns logits [B, num_labels] (and the mean CE loss if target is given).
    """
    n, batch, seq, d = intermediate_outputs.shape
    num_labels = weight.shape[0]
    w_nld, bias_p = prepare_classifier_params(weight, bias, n, d)
    l_pad = w_nld.shape[1]

    x_itemsize = intermediate_outputs.dtype.itemsize
    o_itemsize = jnp.dtype(logits_dtype).itemsize
    vmem_limit = _vmem_budget_bytes()

    if block_b is None:
        block_b = _auto_block_b(batch, n, d, l_pad, x_itemsize, o_itemsize,
                                vmem_limit)
    block_b = max(8, _round_up(int(block_b), 8))
    block_b = min(block_b, _round_up(batch, 8))

    # Zero-copy path: stream the CLS token straight out of the [n, B, S*D]
    # view of the backbone output (first D lanes of each row).  Used only when
    # D is lane-aligned, the per-row contiguous run is DMA-efficient, and the
    # batch tiles exactly (so we never pad — and never copy — the full array).
    use_strided = (d % 128 == 0 and d * x_itemsize >= 512
                   and batch % block_b == 0)
    if use_strided:
        feats = intermediate_outputs.reshape(n, batch, seq * d)  # free reshape
        batch_p = batch
    else:
        # Small contiguous copy of just the CLS tokens ([n, B, D]); any batch
        # padding touches this small array only, never the full backbone out.
        feats = intermediate_outputs[:, :, 0, :]
        batch_p = _round_up(batch, block_b)
        if batch_p != batch:
            feats = jnp.pad(feats, ((0, 0), (0, batch_p - batch), (0, 0)))

    if target is None:
        logits, _ = _linear_head(feats, w_nld, bias_p, None,
                                 block_b=block_b, vmem_limit=vmem_limit,
                                 logits_dtype=logits_dtype)
        return logits[:batch, :num_labels]

    # TODO(synk): targets outside [0, num_labels) silently yield a wrong NLL
    # term (PyTorch raises); validate/clamp upstream if inputs are untrusted.
    tgt = jnp.reshape(target.astype(jnp.int32), (batch, 1))
    if batch_p != batch:
        tgt = jnp.pad(tgt, ((0, batch_p - batch), (0, 0)))
    logits, nll = _linear_head(feats, w_nld, bias_p, tgt,
                               block_b=block_b, vmem_limit=vmem_limit,
                               logits_dtype=logits_dtype)
    loss = jnp.sum(nll[:batch, 0]) / batch     # mean CE over the true batch
    return logits[:batch, :num_labels], loss


if __name__ == "__main__":
    keys = jax.random.split(jax.random.PRNGKey(0), 6)

    # ---- Config A: ViT-style shapes; contiguous-CLS path, auto tile, f32 out.
    n, batch, seq, d, labels = 4, 32, 5, 128, 16
    feats_a = jax.random.normal(keys[0], (n, batch, seq, d),
                                jnp.float32).astype(jnp.bfloat16)
    weight_a = 0.01 * jax.random.normal(keys[1], (labels, n * d), jnp.float32)
    bias_a = jnp.zeros((labels,), jnp.float32)
    target_a = jax.random.randint(keys[2], (batch,), 0, labels, jnp.int32)

    logits_a = vit_linear_forward(feats_a, weight_a, bias_a,
                                  logits_dtype=jnp.float32)
    logits_a = jax.block_until_ready(logits_a)
    logits_a2, loss_a = vit_linear_forward(feats_a, weight_a, bias_a,
                                           target=target_a,
                                           logits_dtype=jnp.float32)
    jax.block_until_ready((logits_a2, loss_a))

    cls_a = jnp.transpose(feats_a[:, :, 0, :], (1, 0, 2)).reshape(batch, -1)
    cls_a = cls_a.astype(jnp.float32)
    w_a = weight_a.astype(jnp.bfloat16).astype(jnp.float32)
    ref_logits_a = cls_a @ w_a.T + bias_a
    ref_lse_a = jax.nn.logsumexp(ref_logits_a, axis=-1)
    ref_loss_a = jnp.mean(ref_lse_a - ref_logits_a[jnp.arange(batch), target_a])

    assert logits_a.shape == (batch, labels)
    assert jnp.allclose(logits_a, ref_logits_a, atol=2e-3, rtol=2e-3)
    assert jnp.allclose(logits_a2, ref_logits_a, atol=2e-3, rtol=2e-3)
    assert jnp.allclose(loss_a, ref_loss_a, atol=2e-3, rtol=2e-3)

    # ---- Config B: zero-copy strided CLS path, multi-tile grid, bf16 logits.
    n2, b2, s2, d2, l2 = 2, 48, 3, 256, 10
    feats_b = jax.random.normal(keys[3], (n2, b2, s2, d2),
                                jnp.float32).astype(jnp.bfloat16)
    weight_b = 0.01 * jax.random.normal(keys[4], (l2, n2 * d2), jnp.float32)
    bias_b = jnp.zeros((l2,), jnp.float32)
    target_b = jax.random.randint(keys[5], (b2,), 0, l2, jnp.int32)

    # block_b=16 -> 3 batch tiles, exercising the pipelined multi-tile grid.
    logits_b, loss_b = vit_linear_forward(feats_b, weight_b, bias_b,
                                          target=target_b, block_b=16)
    jax.block_until_ready((logits_b, loss_b))

    cls_b = jnp.transpose(feats_b[:, :, 0, :], (1, 0, 2)).reshape(b2, -1)
    cls_b = cls_b.astype(jnp.float32)
    w_b = weight_b.astype(jnp.bfloat16).astype(jnp.float32)
    ref_logits_b = cls_b @ w_b.T + bias_b
    ref_lse_b = jax.nn.logsumexp(ref_logits_b, axis=-1)
    ref_loss_b = jnp.mean(ref_lse_b - ref_logits_b[jnp.arange(b2), target_b])

    assert logits_b.shape == (b2, l2)
    assert jnp.allclose(logits_b.astype(jnp.float32), ref_logits_b,
                        atol=1.5e-2, rtol=1.5e-2)     # bf16 logits writeback
    assert jnp.allclose(loss_b, ref_loss_b, atol=3e-3, rtol=3e-3)

    print("KERNEL_OK")
</pallas_src>

<mosaic_0001>
module attributes {stable_mosaic.version = 11 : i64} {
  func.func @_infer_kernel(%arg0: i32, %arg1: memref<4x32x128xbf16, #tpu.memory_space<vmem>>, %arg2: memref<4x128x128xbf16, #tpu.memory_space<vmem>>, %arg3: memref<1x128xf32, #tpu.memory_space<vmem>>, %arg4: memref<32x128xf32, #tpu.memory_space<vmem>>, %arg5: memref<32x128xf32, #tpu.memory_space<vmem>>) attributes {dimension_semantics = [#tpu.dimension_semantics<parallel>], iteration_bounds = array<i64: 1>, scalar_prefetch = 0 : i64, scratch_operands = 1 : i64, tpu.core_type = #tpu.core_type<tc>, window_params = [{transform_indices = @transform_0, window_bounds = array<i64: 4, 32, 128>}, {pipeline_mode = #tpu.pipeline_mode<synchronous>, transform_indices = @transform_1, window_bounds = array<i64: 4, 128, 128>}, {pipeline_mode = #tpu.pipeline_mode<synchronous>, transform_indices = @transform_2, window_bounds = array<i64: 1, 128>}, {transform_indices = @transform_3, window_bounds = array<i64: 32, 128>}]} {
    %c0 = arith.constant 0 : index
    %c0_0 = arith.constant 0 : index
    %c0_1 = arith.constant 0 : index
    %0 = vector.load %arg1[%c0, %c0_0, %c0_1] : memref<4x32x128xbf16, #tpu.memory_space<vmem>>, vector<1x32x128xbf16>
    %1 = vector.shape_cast %0 : vector<1x32x128xbf16> to vector<32x128xbf16>
    %c0_2 = arith.constant 0 : index
    %c0_3 = arith.constant 0 : index
    %c0_4 = arith.constant 0 : index
    %2 = vector.load %arg2[%c0_2, %c0_3, %c0_4] : memref<4x128x128xbf16, #tpu.memory_space<vmem>>, vector<1x128x128xbf16>
    %3 = vector.shape_cast %2 : vector<1x128x128xbf16> to vector<128x128xbf16>
    %cst = arith.constant dense<0.000000e+00> : vector<32x128xf32>
    %4 = tpu.matmul %1, %3, %cst {dimension_numbers = #tpu.dot_dimension_numbers<[1], [1], [0], [0], [0, 0, 1, 0], [], []>} : vector<32x128xbf16>, vector<128x128xbf16>, vector<32x128xf32> -> vector<32x128xf32>
    %c0_5 = arith.constant 0 : index
    %c0_6 = arith.constant 0 : index
    %5 = vector.load %arg5[%c0_5, %c0_6] : memref<32x128xf32, #tpu.memory_space<vmem>>, vector<32x128xf32>
    tpu.vector_store %arg5[%c0_5, %c0_6], %4 {strides = array<i32>} : memref<32x128xf32, #tpu.memory_space<vmem>>, vector<32x128xf32>,
    %c1 = arith.constant 1 : index
    %c0_7 = arith.constant 0 : index
    %c0_8 = arith.constant 0 : index
    %6 = vector.load %arg1[%c1, %c0_7, %c0_8] : memref<4x32x128xbf16, #tpu.memory_space<vmem>>, vector<1x32x128xbf16>
    %7 = vector.shape_cast %6 : vector<1x32x128xbf16> to vector<32x128xbf16>
    %c1_9 = arith.constant 1 : index
    %c0_10 = arith.constant 0 : index
    %c0_11 = arith.constant 0 : index
    %8 = vector.load %arg2[%c1_9, %c0_10, %c0_11] : memref<4x128x128xbf16, #tpu.memory_space<vmem>>, vector<1x128x128xbf16>
    %9 = vector.shape_cast %8 : vector<1x128x128xbf16> to vector<128x128xbf16>
    %cst_12 = arith.constant dense<0.000000e+00> : vector<32x128xf32>
    %10 = tpu.matmul %7, %9, %cst_12 {dimension_numbers = #tpu.dot_dimension_numbers<[1], [1], [0], [0], [0, 0, 1, 0], [], []>} : vector<32x128xbf16>, vector<128x128xbf16>, vector<32x128xf32> -> vector<32x128xf32>
    %c0_13 = arith.constant 0 : index
    %c0_14 = arith.constant 0 : index
    %11 = vector.load %arg5[%c0_13, %c0_14] : memref<32x128xf32, #tpu.memory_space<vmem>>, vector<32x128xf32>
    %12 = arith.addf %11, %10 : vector<32x128xf32>
    %c0_15 = arith.constant 0 : index
    %c0_16 = arith.constant 0 : index
    %13 = vector.load %arg5[%c0_15, %c0_16] : memref<32x128xf32, #tpu.memory_space<vmem>>, vector<32x128xf32>
    tpu.vector_store %arg5[%c0_15, %c0_16], %12 {strides = array<i32>} : memref<32x128xf32, #tpu.memory_space<vmem>>, vector<32x128xf32>,
    %c2 = arith.constant 2 : index
    %c0_17 = arith.constant 0 : index
    %c0_18 = arith.constant 0 : index
    %14 = vector.load %arg1[%c2, %c0_17, %c0_18] : memref<4x32x128xbf16, #tpu.memory_space<vmem>>, vector<1x32x128xbf16>
    %15 = vector.shape_cast %14 : vector<1x32x128xbf16> to vector<32x128xbf16>
    %c2_19 = arith.constant 2 : index
    %c0_20 = arith.constant 0 : index
    %c0_21 = arith.constant 0 : index
    %16 = vector.load %arg2[%c2_19, %c0_20, %c0_21] : memref<4x128x128xbf16, #tpu.memory_space<vmem>>, vector<1x128x128xbf16>
    %17 = vector.shape_cast %16 : vector<1x128x128xbf16> to vector<128x128xbf16>
    %cst_22 = arith.constant dense<0.000000e+00> : vector<32x128xf32>
    %18 = tpu.matmul %15, %17, %cst_22 {dimension_numbers = #tpu.dot_dimension_numbers<[1], [1], [0], [0], [0, 0, 1, 0], [], []>} : vector<32x128xbf16>, vector<128x128xbf16>, vector<32x128xf32> -> vector<32x128xf32>
    %c0_23 = arith.constant 0 : index
    %c0_24 = arith.constant 0 : index
    %19 = vector.load %arg5[%c0_23, %c0_24] : memref<32x128xf32, #tpu.memory_space<vmem>>, vector<32x128xf32>
    %20 = arith.addf %19, %18 : vector<32x128xf32>
    %c0_25 = arith.constant 0 : index
    %c0_26 = arith.constant 0 : index
    %21 = vector.load %arg5[%c0_25, %c0_26] : memref<32x128xf32, #tpu.memory_space<vmem>>, vector<32x128xf32>
    tpu.vector_store %arg5[%c0_25, %c0_26], %20 {strides = array<i32>} : memref<32x128xf32, #tpu.memory_space<vmem>>, vector<32x128xf32>,
    %c3 = arith.constant 3 : index
    %c0_27 = arith.constant 0 : index
    %c0_28 = arith.constant 0 : index
    %22 = vector.load %arg1[%c3, %c0_27, %c0_28] : memref<4x32x128xbf16, #tpu.memory_space<vmem>>, vector<1x32x128xbf16>
    %23 = vector.shape_cast %22 : vector<1x32x128xbf16> to vector<32x128xbf16>
    %c3_29 = arith.constant 3 : index
    %c0_30 = arith.constant 0 : index
    %c0_31 = arith.constant 0 : index
    %24 = vector.load %arg2[%c3_29, %c0_30, %c0_31] : memref<4x128x128xbf16, #tpu.memory_space<vmem>>, vector<1x128x128xbf16>
    %25 = vector.shape_cast %24 : vector<1x128x128xbf16> to vector<128x128xbf16>
    %cst_32 = arith.constant dense<0.000000e+00> : vector<32x128xf32>
    %26 = tpu.matmul %23, %25, %cst_32 {dimension_numbers = #tpu.dot_dimension_numbers<[1], [1], [0], [0], [0, 0, 1, 0], [], []>} : vector<32x128xbf16>, vector<128x128xbf16>, vector<32x128xf32> -> vector<32x128xf32>
    %c0_33 = arith.constant 0 : index
    %c0_34 = arith.constant 0 : index
    %27 = vector.load %arg5[%c0_33, %c0_34] : memref<32x128xf32, #tpu.memory_space<vmem>>, vector<32x128xf32>
    %28 = arith.addf %27, %26 : vector<32x128xf32>
    %c0_35 = arith.constant 0 : index
    %c0_36 = arith.constant 0 : index
    %29 = vector.load %arg5[%c0_35, %c0_36] : memref<32x128xf32, #tpu.memory_space<vmem>>, vector<32x128xf32>
    tpu.vector_store %arg5[%c0_35, %c0_36], %28 {strides = array<i32>} : memref<32x128xf32, #tpu.memory_space<vmem>>, vector<32x128xf32>,
    %c0_37 = arith.constant 0 : index
    %c0_38 = arith.constant 0 : index
    %30 = vector.load %arg5[%c0_37, %c0_38] : memref<32x128xf32, #tpu.memory_space<vmem>>, vector<32x128xf32>
    %c0_39 = arith.constant 0 : index
    %c0_40 = arith.constant 0 : index
    %31 = vector.load %arg3[%c0_39, %c0_40] : memref<1x128xf32, #tpu.memory_space<vmem>>, vector<1x128xf32>
    %32 = vector.broadcast %31 : vector<1x128xf32> to vector<32x128xf32>
    %33 = arith.addf %30, %32 : vector<32x128xf32>
    %c0_41 = arith.constant 0 : index
    %c0_42 = arith.constant 0 : index
    %34 = vector.load %arg4[%c0_41, %c0_42] : memref<32x128xf32, #tpu.memory_space<vmem>>, vector<32x128xf32>
    tpu.vector_store %arg4[%c0_41, %c0_42], %33 {strides = array<i32>} : memref<32x128xf32, #tpu.memory_space<vmem>>, vector<32x128xf32>,
    return
  }
  func.func @transform_0(%arg0: i32) -> (i32, i32, i32) {
    %c0_i32 = arith.constant 0 : i32
    %c0_i32_0 = arith.constant 0 : i32
    %c0_i32_1 = arith.constant 0 : i32
    return %c0_i32, %arg0, %c0_i32_0 : i32, i32, i32
  }
  func.func @transform_1(%arg0: i32) -> (i32, i32, i32) {
    %c0_i32 = arith.constant 0 : i32
    %c0_i32_0 = arith.constant 0 : i32
    %c0_i32_1 = arith.constant 0 : i32
    %c0_i32_2 = arith.constant 0 : i32
    return %c0_i32, %c0_i32_0, %c0_i32_1 : i32, i32, i32
  }
  func.func @transform_2(%arg0: i32) -> (i32, i32) {
    %c0_i32 = arith.constant 0 : i32
    %c0_i32_0 = arith.constant 0 : i32
    %c0_i32_1 = arith.constant 0 : i32
    return %c0_i32, %c0_i32_0 : i32, i32
  }
  func.func @transform_3(%arg0: i32) -> (i32, i32) {
    %c0_i32 = arith.constant 0 : i32
    %c0_i32_0 = arith.constant 0 : i32
    return %arg0, %c0_i32 : i32, i32
  }
}

</mosaic_0001>

<bundles_post_ra>
// kernel: _linear_head.1
= control target key start
LH: loop header
LB: loop body
LE: loop exit
PB: predicated region body
PF: predicated region fallthrough
CT: control target
= control target key end

     0   :  { %8 = vsyncpa [#allocation4], 0  ;;  %s850_s0 = inlined_call_operand.hbm [shape: bf16[4,32,128], index: 0, kind: input, shape index: {}]   ;;  %s851_s1 = inlined_call_operand.hbm [shape: bf16[4,128,128], index: 1, kind: input, shape index: {}]   ;;  %s852_s2 = inlined_call_operand.vmem [shape: f32[1,128], index: 2, kind: input, shape index: {}]   ;;  %s853_s3 = inlined_call_operand.hbm [shape: f32[32,128], index: 3, kind: output, shape index: {}]  }
   0x1   :  { %9 = vsyncpa [#allocation7], 0 }
   0x2   :  { %10 = vsyncpa [#allocation5], 0  ;;  %s15_s14 = sshll.u32 %s850_s0, 4  ;;  %s811_s15 = smov [#allocation3]   ;;  %s16_s14 = int_to_ptr.hbm [resolvable:$true] %s15_s14 }
   0x3   :  { %s17_s16 = sshll.u32 %s811_s15, 4  ;;  %s28_s19 = sshll.u32 %s851_s1, 4  ;;  %s18_s16 = int_to_ptr.vmem [resolvable:$true] %s17_s16  ;;  %s29_s19 = int_to_ptr.hbm [resolvable:$true] %s28_s19 }
   0x4   :  { %s812_s20 = smov 64   ;;  %s813_s21 = smov 4  }
   0x5   :  { %23 = dma.hbm_to_vmem [thread:$0]  %s16_s14, 1024, %s18_s16, [#allocation4], %s812_s20, %s812_s20, %s813_s21  }
   0x6   :  { %s814_s22 = smov [#allocation6]  }
   0x7   :  { %s30_s23 = sshll.u32 %s814_s22, 4  ;;  %s31_s23 = int_to_ptr.vmem [resolvable:$true] %s30_s23 }
   0x8   :  { %36 = dma.hbm_to_vmem [thread:$0]  %s29_s19, 4096, %s31_s23, [#allocation7], %s812_s20, %s812_s20, %s813_s21  }
   0x9   :  { %805 = dma.done.wait [#allocation4], 1024  }
   0xa   :  { %806 = vsyncadd [#allocation4], 4294966272 }
   0xb   :  { %807 = dma.done.wait [#allocation7], 4096  }
   0xc   :  { %808 = vsyncadd [#allocation7], 4294963200  ;;  %v694_v0 = vld [vmem:[#allocation6 + $0x38] sm:$0xff]  ;;  %v693_v4 = vld [vmem:[#allocation6 + $0x30] sm:$0xff]  ;;  %s511_s27 = sshll.u32 %s853_s3, 4  ;;  %s816_s28 = smov 128   ;;  %s512_s27 = int_to_ptr.hbm [resolvable:$true] %s511_s27 }
   0xd   :  { %v704_v1 = vld [vmem:[#allocation6 + $0x78] sm:$0xff]  ;;  %127 = vmatpush.bf16.xpose.msra.mxu0 %v694_v0  ;;  %v703_v5 = vld [vmem:[#allocation6 + $0x70] sm:$0xff]  ;;  %v692_v8 = vld [vmem:[#allocation6 + $0x28] sm:$0xff]  ;;  %s817_s29 = smov 8  }
   0xe   :  { %v714_v2 = vld [vmem:[#allocation6 + $0xb8] sm:$0xff]  ;;  %232 = vmatpush.bf16.xpose.msra.mxu1 %v704_v1  ;;  %v713_v6 = vld [vmem:[#allocation6 + $0xb0] sm:$0xff]  ;;  %v702_v9 = vld [vmem:[#allocation6 + $0x68] sm:$0xff] }
   0xf   :  { %v724_v3 = vld [vmem:[#allocation6 + $0xf8] sm:$0xff]  ;;  %345 = vmatpush.bf16.xpose.msra.mxu2 %v714_v2  ;;  %v723_v7 = vld [vmem:[#allocation6 + $0xf0] sm:$0xff]  ;;  %v712_v10 = vld [vmem:[#allocation6 + $0xa8] sm:$0xff] }
  0x10   :  { %458 = vmatpush.bf16.xpose.msra.mxu3 %v724_v3  ;;  %v722_v11 = vld [vmem:[#allocation6 + $0xe8] sm:$0xff]  ;;  %v691_v12 = vld [vmem:[#allocation6 + $0x20] sm:$0xff]  ;;  %v690_v16 = vld [vmem:[#allocation6 + $0x18] sm:$0xff] }
  0x11   :  { %v701_v13 = vld [vmem:[#allocation6 + $0x60] sm:$0xff]  ;;  %v700_v17 = vld [vmem:[#allocation6 + $0x58] sm:$0xff]  ;;  %v689_v20 = vld [vmem:[#allocation6 + $0x10] sm:$0xff] }
  0x12   :  { %v711_v14 = vld [vmem:[#allocation6 + $0xa0] sm:$0xff]  ;;  %v710_v18 = vld [vmem:[#allocation6 + $0x98] sm:$0xff]  ;;  %v699_v21 = vld [vmem:[#allocation6 + $0x50] sm:$0xff] }
  0x13   :  { %v721_v15 = vld [vmem:[#allocation6 + $0xe0] sm:$0xff]  ;;  %v720_v19 = vld [vmem:[#allocation6 + $0xd8] sm:$0xff]  ;;  %v709_v22 = vld [vmem:[#allocation6 + $0x90] sm:$0xff] }
  0x14   :  { %v719_v23 = vld [vmem:[#allocation6 + $0xd0] sm:$0xff]  ;;  %v688_v24 = vld [vmem:[#allocation6 + $0x8] sm:$0xff]  ;;  %v687_v28 = vld [vmem:[#allocation6] sm:$0xff] }
  0x15   :  { %128 = vmatpush.bf16.xpose.msra.mxu0 %v693_v4  ;;  %v698_v25 = vld [vmem:[#allocation6 + $0x48] sm:$0xff]  ;;  %v697_v29 = vld [vmem:[#allocation6 + $0x40] sm:$0xff]  ;;  %v695_v33 = vld [vmem:[#allocation3 + $0x10] sm:$0xff] }
  0x16   :  { %233 = vmatpush.bf16.xpose.msra.mxu1 %v703_v5  ;;  %v708_v26 = vld [vmem:[#allocation6 + $0x88] sm:$0xff]  ;;  %v707_v30 = vld [vmem:[#allocation6 + $0x80] sm:$0xff]  ;;  %v715_v35 = vld [vmem:[#allocation3 + $0x30] sm:$0xff] }
  0x17   :  { %346 = vmatpush.bf16.xpose.msra.mxu2 %v713_v6  ;;  %v718_v27 = vld [vmem:[#allocation6 + $0xc8] sm:$0xff]  ;;  %v717_v31 = vld [vmem:[#allocation6 + $0xc0] sm:$0xff]  ;;  %v696_v37 = vld [vmem:[#allocation3 + $0x18] sm:$0xff] }
  0x18   :  { %459 = vmatpush.bf16.xpose.msra.mxu3 %v723_v7  ;;  %v685_v32 = vld [vmem:[#allocation3] sm:$0xff]  ;;  %v686_v36 = vld [vmem:[#allocation3 + $0x8] sm:$0xff]  ;;  %v716_v39 = vld [vmem:[#allocation3 + $0x38] sm:$0xff] }
  0x19   :  { %v705_v34 = vld [vmem:[#allocation3 + $0x20] sm:$0xff]  ;;  %v706_v38 = vld [vmem:[#allocation3 + $0x28] sm:$0xff] }
  0x1a   :  { %v732_v46 = vld [vmem:[%s852_s2] ss:$0 sm:$0xff]  ;;  %s815_s2 = smov [#allocation8]  }
  0x1b   :  { %s509_s24 = sshll.u32 %s815_s2, 4  ;;  %s510_s24 = int_to_ptr.vmem [resolvable:$true] %s509_s24 }
  0x1d   :  { %129 = vmatpush.bf16.xpose.msra.mxu0 %v692_v8 }
  0x1e   :  { %234 = vmatpush.bf16.xpose.msra.mxu1 %v702_v9 }
  0x1f   :  { %347 = vmatpush.bf16.xpose.msra.mxu2 %v712_v10 }
  0x20   :  { %460 = vmatpush.bf16.xpose.msra.mxu3 %v722_v11 }
  0x25   :  { %130 = vmatpush.bf16.xpose.msra.mxu0 %v691_v12 }
  0x26   :  { %235 = vmatpush.bf16.xpose.msra.mxu1 %v701_v13 }
  0x27   :  { %348 = vmatpush.bf16.xpose.msra.mxu2 %v711_v14 }
  0x28   :  { %461 = vmatpush.bf16.xpose.msra.mxu3 %v721_v15 }
  0x2d   :  { %131 = vmatpush.bf16.xpose.msra.mxu0 %v690_v16 }
  0x2e   :  { %236 = vmatpush.bf16.xpose.msra.mxu1 %v700_v17 }
  0x2f   :  { %349 = vmatpush.bf16.xpose.msra.mxu2 %v710_v18 }
  0x30   :  { %462 = vmatpush.bf16.xpose.msra.mxu3 %v720_v19 }
  0x35   :  { %132 = vmatpush.bf16.xpose.msra.mxu0 %v689_v20 }
  0x36   :  { %237 = vmatpush.bf16.xpose.msra.mxu1 %v699_v21 }
  0x37   :  { %350 = vmatpush.bf16.xpose.msra.mxu2 %v709_v22 }
  0x38   :  { %463 = vmatpush.bf16.xpose.msra.mxu3 %v719_v23 }
  0x3d   :  { %133 = vmatpush.bf16.xpose.msra.mxu0 %v688_v24 }
  0x3e   :  { %238 = vmatpush.bf16.xpose.msra.mxu1 %v698_v25 }
  0x3f   :  { %351 = vmatpush.bf16.xpose.msra.mxu2 %v708_v26 }
  0x40   :  { %464 = vmatpush.bf16.xpose.msra.mxu3 %v718_v27 }
  0x45   :  { %134 = vmatpush.bf16.xpose.msra.mxu0 %v687_v28 }
  0x46   :  { %239 = vmatpush.bf16.xpose.msra.mxu1 %v697_v29 }
  0x47   :  { %352 = vmatpush.bf16.xpose.msra.mxu2 %v707_v30 }
  0x48   :  { %465 = vmatpush.bf16.xpose.msra.mxu3 %v717_v31 }
  0x4c   :  { %135 = vmatmul.bf16.vlgmr.msra.gmra.mxu0 %v685_v32 }
  0x4d   :  { %240 = vmatmul.bf16.vlgmr.msra.gmra.mxu1 %v695_v33 }
  0x4e   :  { %353 = vmatmul.bf16.vlgmr.msra.gmra.mxu2 %v705_v34 }
  0x4f   :  { %466 = vmatmul.bf16.vlgmr.msra.gmra.mxu3 %v715_v35 }
  0x5c   :  { %140 = vmatmul.bf16.gmra.mxu0 %v686_v36 }
  0x5d   :  { %245 = vmatmul.bf16.gmra.mxu1 %v696_v37 }
  0x5e   :  { %358 = vmatmul.bf16.gmra.mxu2 %v706_v38 }
  0x5f   :  { %471 = vmatmul.bf16.gmra.mxu3 %v716_v39 }
  0xc9   :  { %v136_v40 = vpop.f32.mrf.mxu0 }
  0xca   :  { %v241_v41 = vpop.f32.mrf.mxu1 }
  0xcb   :  { %v255_v42 = vadd.f32 %v241_v41, %v136_v40 }
  0xd1   :  { %v354_v43 = vpop.f32.mrf.mxu2  ;;  %v138_v47 = vpop.f32.mrf.mxu0 }
  0xd2   :  { %v467_v44 = vpop.f32.mrf.mxu3  ;;  %v368_v45 = vadd.f32 %v354_v43, %v255_v42  ;;  %v243_v48 = vpop.f32.mrf.mxu1 }
  0xd3   :  { %v256_v51 = vadd.f32 %v243_v48, %v138_v47 }
  0xd4   :  { %v481_v49 = vadd.f32 %v467_v44, %v368_v45 }
  0xd6   :  { %v497_v50 = vadd.f32 %v732_v46, %v481_v49 }
  0xd8   :  { %501 = vst [vmem:[#allocation8] sm:$0xff] %v497_v50 }
  0xd9   :  { %v356_v52 = vpop.f32.mrf.mxu2  ;;  %v141_v55 = vpop.f32.mrf.mxu0 }
  0xda   :  { %v469_v53 = vpop.f32.mrf.mxu3  ;;  %v369_v54 = vadd.f32 %v356_v52, %v256_v51  ;;  %v246_v56 = vpop.f32.mrf.mxu1 }
  0xdb   :  { %v257_v59 = vadd.f32 %v246_v56, %v141_v55 }
  0xdc   :  { %v482_v57 = vadd.f32 %v469_v53, %v369_v54 }
  0xde   :  { %v498_v58 = vadd.f32 %v732_v46, %v482_v57 }
  0xe0   :  { %502 = vst [vmem:[#allocation8 + $0x8] sm:$0xff] %v498_v58 }
  0xe1   :  { %v359_v60 = vpop.f32.mrf.mxu2  ;;  %v143_v0 = vpop.f32.mrf.mxu0 }
  0xe2   :  { %v472_v61 = vpop.f32.mrf.mxu3  ;;  %v370_v62 = vadd.f32 %v359_v60, %v257_v59  ;;  %v248_v1 = vpop.f32.mrf.mxu1 }
  0xe3   :  { %v258_v3 = vadd.f32 %v248_v1, %v143_v0 }
  0xe4   :  { %v483_v63 = vadd.f32 %v472_v61, %v370_v62 }
  0xe6   :  { %v499_v2 = vadd.f32 %v732_v46, %v483_v63 }
  0xe8   :  { %503 = vst [vmem:[#allocation8 + $0x10] sm:$0xff] %v499_v2 }
  0xe9   :  { %v361_v4 = vpop.f32.mrf.mxu2 }
  0xea   :  { %v371_v5 = vadd.f32 %v361_v4, %v258_v3  ;;  %v474_v6 = vpop.f32.mrf.mxu3 }
  0xec   :  { %v484_v7 = vadd.f32 %v474_v6, %v371_v5 }
  0xee   :  { %v500_v8 = vadd.f32 %v732_v46, %v484_v7 }
  0xf0   :  { %504 = vst [vmem:[#allocation8 + $0x18] sm:$0xff] %v500_v8 }
  0xf1   :  { %517 = dma.vmem_to_hbm [thread:$0]  %s510_s24, 512, %s512_s27, [#allocation5], %s816_s28, %s816_s28, %s817_s29  }
  0xf2   :  { %809 = dma.done.wait [#allocation5], 512  }
  0xf3   :  { %810 = vsyncadd [#allocation5], 4294966784 }
  0xf4   :  { %522 = vsyncpa [#allocation4], 1 }
  0xf5   :  { %523 = vsyncpa [#allocation7], 1 }
  0xf6   :  { %524 = vsyncpa [#allocation5], 1 }

</bundles_post_ra>
